<compile_context>
chip_gen: v5e
topology: v5e:2x2
jax: 0.10.0
libtpu: 0.0.40
codegen_flags: <defaults>
</compile_context>

<pallas_src>
import jax
import jax.numpy as jnp
from jax.experimental import pallas as pl
from jax.experimental.pallas import tpu as pltpu

HID = 10  # hidden width fixed by the module definition


def _round_up(v, m):
    return ((v + m - 1) // m) * m


def _pick_env_chunk(n_envs, batch, cap_rows=1024):
    """Largest divisor of n_envs whose row count (chunk*batch) stays <= cap_rows.

    If batch is not a sublane multiple, fall back to one env per step so the
    in-kernel reshapes are pure unit-dim squeezes (always layout-preserving).
    """
    if batch % 8 != 0:
        return 1
    cap = max(1, cap_rows // max(batch, 1))
    for c in range(min(n_envs, cap), 0, -1):
        if n_envs % c == 0:
            return c
    return 1


def policy_kernel(x_ref, w_ref, b_ref, o_ref, xpad_ref):
    """One chunk of environments per grid step.

    x_ref   : (EC, B, f_in)   unpadded input features
    w_ref   : (4, D, D)       packed zero-padded weights (w1, w2, w3@w4, w5)
    b_ref   : (4, 1, D)       packed zero-padded biases  (b1, b2, b3@w4+b4, b5)
    o_ref   : (EC, B, n_arms) probabilities (softmax over dim 0, per env)
    xpad_ref: (EC*B, D)       VMEM scratch used to zero-pad x to width D
    """
    ec, bsz, f_in = x_ref.shape
    d = w_ref.shape[-1]
    n_arms = o_ref.shape[-1]
    rows = ec * bsz

    # Zero-pad input features to the packed width D inside VMEM (no HBM pass).
    xpad_ref[...] = jnp.zeros_like(xpad_ref)
    xpad_ref[:, :f_in] = x_ref[...].reshape(rows, f_in)
    x = xpad_ref[...]                                               # (rows, D)

    # --- encoder layers 1 & 2 (one matmul each over ALL rows of the chunk) ---
    h = jnp.tanh(jnp.dot(x, w_ref[0],
                         preferred_element_type=jnp.float32) + b_ref[0])
    h = jnp.tanh(jnp.dot(h, w_ref[1],
                         preferred_element_type=jnp.float32) + b_ref[1])
    # --- folded enc(10->1) + dec(1->10): single 10x10 matmul (exact fold,
    #     no activation between those two Linears in the original module) ---
    h = jnp.tanh(jnp.dot(h, w_ref[2],
                         preferred_element_type=jnp.float32) + b_ref[2])
    # --- decoder output layer ---
    logits = jnp.dot(h, w_ref[3],
                     preferred_element_type=jnp.float32) + b_ref[3]  # (rows, D)

    # --- softmax over dim=0 (batch axis of each env, per arm column) ---
    logits = logits.reshape(ec, bsz, d)
    m = jnp.max(logits, axis=1, keepdims=True)                      # (EC, 1, D)
    e = jnp.exp(logits - m)
    s = jnp.sum(e, axis=1, keepdims=True)                           # (EC, 1, D)
    probs = e * pl.reciprocal(s, approx=True)
    # Padded arm columns are dropped here; the kernel writes (EC, B, n_arms).
    o_ref[...] = probs[:, :, :n_arms]


def pack_params(params):
    """Fold the 10->1->10 bottleneck and pack into two zero-padded slabs.

    Call ONCE at parameter-init time (hoisted out of the forward hot path).
    """
    f_in = params["w1"].shape[0]
    n_arms = params["w5"].shape[1]
    d = _round_up(max(f_in, HID, n_arms), 8)

    w34 = params["w3"] @ params["w4"]                     # (10, 10), exact fold
    b34 = params["b3"] @ params["w4"] + params["b4"]      # (1, 10)

    ws = [params["w1"], params["w2"], w34, params["w5"]]
    bs = [params["b1"], params["b2"], b34, params["b5"]]

    wp = jnp.zeros((4, d, d), jnp.float32)
    bp = jnp.zeros((4, 1, d), jnp.float32)
    for i, (w, b) in enumerate(zip(ws, bs)):
        wp = wp.at[i, : w.shape[0], : w.shape[1]].set(w)
        bp = bp.at[i, :, : b.shape[1]].set(b)
    return wp, bp


def policy_forward_batched(xs, wp, bp):
    """xs: (E, B, n_arms+1) f32; wp/bp from pack_params(). Returns (E, B, n_arms).

    Each environment e gets softmax over dim 0 (its own B axis), matching
    Policy.forward applied independently to each xs[e].
    """
    E, B, f_in = xs.shape
    n_arms = f_in - 1
    D = wp.shape[-1]

    ec = _pick_env_chunk(E, B)       # envs per grid step (all of them if small)
    n_chunks = E // ec

    return pl.pallas_call(
        policy_kernel,
        out_shape=jax.ShapeDtypeStruct((E, B, n_arms), jnp.float32),
        grid_spec=pltpu.PrefetchScalarGridSpec(
            num_scalar_prefetch=0,
            grid=(n_chunks,),
            in_specs=[
                pl.BlockSpec((ec, B, f_in), lambda i: (i, 0, 0)),  # env chunk
                pl.BlockSpec((4, D, D), lambda i: (0, 0, 0)),      # weights resident
                pl.BlockSpec((4, 1, D), lambda i: (0, 0, 0)),      # biases resident
            ],
            out_specs=pl.BlockSpec((ec, B, n_arms), lambda i: (i, 0, 0)),
            scratch_shapes=[pltpu.VMEM((ec * B, D), jnp.float32)],
        ),
        compiler_params=pltpu.CompilerParams(
            dimension_semantics=(("parallel",) if n_chunks > 1
                                 else ("arbitrary",))),
    )(xs, wp, bp)


def policy_forward(x, wp, bp):
    """x: (B, n_arms+1) f32 — matches Policy.forward (softmax over dim 0)."""
    return policy_forward_batched(x[None], wp, bp)[0]


def init_params(key, n_arms):
    """Deterministic parameter init. Weights stored transposed: (in, out)."""
    ks = jax.random.split(key, 10)

    def lin(kw, kb, fan_in, fan_out):
        # Uniform(-1/sqrt(fan_in), 1/sqrt(fan_in)) like torch.nn.Linear default.
        bound = 1.0 / jnp.sqrt(jnp.float32(fan_in))
        w = jax.random.uniform(kw, (fan_in, fan_out), jnp.float32, -bound, bound)
        b = jax.random.uniform(kb, (1, fan_out), jnp.float32, -bound, bound)
        return w, b

    w1, b1 = lin(ks[0], ks[1], n_arms + 1, HID)
    w2, b2 = lin(ks[2], ks[3], HID, HID)
    w3, b3 = lin(ks[4], ks[5], HID, 1)
    w4, b4 = lin(ks[6], ks[7], 1, HID)
    w5, b5 = lin(ks[8], ks[9], HID, n_arms)
    return dict(w1=w1, b1=b1, w2=w2, b2=b2, w3=w3, b3=b3,
                w4=w4, b4=b4, w5=w5, b5=b5)


if __name__ == "__main__":
    n_arms = 8
    batch = 8
    n_envs = 4

    key = jax.random.PRNGKey(0)
    k_x, k_p = jax.random.split(key)
    xs = jax.random.normal(k_x, (n_envs, batch, n_arms + 1), jnp.float32)
    params = init_params(k_p, n_arms)

    # Parameter fold/pad/pack done once, outside the forward hot path.
    wp, bp = pack_params(params)

    fwd = jax.jit(policy_forward_batched)
    out = jax.block_until_ready(fwd(xs, wp, bp))

    # Pure-JAX reference using the ORIGINAL (unfused) weights.
    def ref_fn(x):
        h = jnp.tanh(x @ params["w1"] + params["b1"])
        h = jnp.tanh(h @ params["w2"] + params["b2"])
        z = h @ params["w3"] + params["b3"]
        d = jnp.tanh(z @ params["w4"] + params["b4"])
        logits = d @ params["w5"] + params["b5"]
        return jax.nn.softmax(logits, axis=0)

    ref = jax.vmap(ref_fn)(xs)

    assert out.shape == (n_envs, batch, n_arms)
    assert jnp.allclose(out, ref, atol=2e-3, rtol=2e-3), "mismatch vs reference"
    assert jnp.allclose(jnp.sum(out, axis=1), 1.0, atol=2e-3), \
        "softmax(dim=0) not normalized"

    # Single-input path, identical to Policy.forward on one (B, n_arms+1) batch.
    out1 = jax.block_until_ready(policy_forward(xs[0], wp, bp))
    assert jnp.allclose(out1, ref_fn(xs[0]), atol=2e-3, rtol=2e-3)

    print("KERNEL_OK")
</pallas_src>

<mosaic_0001>
module attributes {stable_mosaic.version = 11 : i64} {
  func.func @policy_kernel(%arg0: i32, %arg1: memref<4x8x9xf32, #tpu.memory_space<vmem>>, %arg2: memref<4x16x16xf32, #tpu.memory_space<vmem>>, %arg3: memref<4x1x16xf32, #tpu.memory_space<vmem>>, %arg4: memref<4x8x8xf32, #tpu.memory_space<vmem>>, %arg5: memref<32x16xf32, #tpu.memory_space<vmem>>) attributes {dimension_semantics = [#tpu.dimension_semantics<arbitrary>], iteration_bounds = array<i64: 1>, scalar_prefetch = 0 : i64, scratch_operands = 1 : i64, tpu.core_type = #tpu.core_type<tc>, window_params = [{transform_indices = @transform_0, window_bounds = array<i64: 4, 8, 9>}, {pipeline_mode = #tpu.pipeline_mode<synchronous>, transform_indices = @transform_1, window_bounds = array<i64: 4, 16, 16>}, {pipeline_mode = #tpu.pipeline_mode<synchronous>, transform_indices = @transform_2, window_bounds = array<i64: 4, 1, 16>}, {transform_indices = @transform_3, window_bounds = array<i64: 4, 8, 8>}]} {
    %cst = arith.constant 0.000000e+00 : f32
    %0 = vector.broadcast %cst : f32 to vector<32x16xf32>
    %c0 = arith.constant 0 : index
    %c0_0 = arith.constant 0 : index
    %1 = vector.load %arg5[%c0, %c0_0] : memref<32x16xf32, #tpu.memory_space<vmem>>, vector<32x16xf32>
    tpu.vector_store %arg5[%c0, %c0_0], %0 {strides = array<i32>} : memref<32x16xf32, #tpu.memory_space<vmem>>, vector<32x16xf32>,
    %c0_1 = arith.constant 0 : index
    %c0_2 = arith.constant 0 : index
    %c0_3 = arith.constant 0 : index
    %2 = vector.load %arg1[%c0_1, %c0_2, %c0_3] : memref<4x8x9xf32, #tpu.memory_space<vmem>>, vector<4x8x9xf32>
    %3 = vector.shape_cast %2 : vector<4x8x9xf32> to vector<32x9xf32>
    %c0_4 = arith.constant 0 : index
    %c0_5 = arith.constant 0 : index
    %4 = vector.load %arg5[%c0_4, %c0_5] : memref<32x16xf32, #tpu.memory_space<vmem>>, vector<32x9xf32>
    tpu.vector_store %arg5[%c0_4, %c0_5], %3 {strides = array<i32>} : memref<32x16xf32, #tpu.memory_space<vmem>>, vector<32x9xf32>,
    %c0_6 = arith.constant 0 : index
    %c0_7 = arith.constant 0 : index
    %5 = vector.load %arg5[%c0_6, %c0_7] : memref<32x16xf32, #tpu.memory_space<vmem>>, vector<32x16xf32>
    %c0_8 = arith.constant 0 : index
    %c0_9 = arith.constant 0 : index
    %c0_10 = arith.constant 0 : index
    %6 = vector.load %arg2[%c0_8, %c0_9, %c0_10] : memref<4x16x16xf32, #tpu.memory_space<vmem>>, vector<1x16x16xf32>
    %7 = vector.shape_cast %6 : vector<1x16x16xf32> to vector<16x16xf32>
    %cst_11 = arith.constant dense<0.000000e+00> : vector<32x16xf32>
    %8 = tpu.matmul %5, %7, %cst_11 {dimension_numbers = #tpu.dot_dimension_numbers<[1], [0], [0], [1], [0, 0, 1, 1], [], []>} : vector<32x16xf32>, vector<16x16xf32>, vector<32x16xf32> -> vector<32x16xf32>
    %c0_12 = arith.constant 0 : index
    %c0_13 = arith.constant 0 : index
    %c0_14 = arith.constant 0 : index
    %9 = vector.load %arg3[%c0_12, %c0_13, %c0_14] : memref<4x1x16xf32, #tpu.memory_space<vmem>>, vector<1x1x16xf32>
    %10 = vector.shape_cast %9 : vector<1x1x16xf32> to vector<1x16xf32>
    %11 = vector.broadcast %10 : vector<1x16xf32> to vector<32x16xf32>
    %12 = arith.addf %8, %11 : vector<32x16xf32>
    %13 = math.tanh %12 : vector<32x16xf32>
    %c1 = arith.constant 1 : index
    %c0_15 = arith.constant 0 : index
    %c0_16 = arith.constant 0 : index
    %14 = vector.load %arg2[%c1, %c0_15, %c0_16] : memref<4x16x16xf32, #tpu.memory_space<vmem>>, vector<1x16x16xf32>
    %15 = vector.shape_cast %14 : vector<1x16x16xf32> to vector<16x16xf32>
    %cst_17 = arith.constant dense<0.000000e+00> : vector<32x16xf32>
    %16 = tpu.matmul %13, %15, %cst_17 {dimension_numbers = #tpu.dot_dimension_numbers<[1], [0], [0], [1], [0, 0, 1, 1], [], []>} : vector<32x16xf32>, vector<16x16xf32>, vector<32x16xf32> -> vector<32x16xf32>
    %c1_18 = arith.constant 1 : index
    %c0_19 = arith.constant 0 : index
    %c0_20 = arith.constant 0 : index
    %17 = vector.load %arg3[%c1_18, %c0_19, %c0_20] : memref<4x1x16xf32, #tpu.memory_space<vmem>>, vector<1x1x16xf32>
    %18 = vector.shape_cast %17 : vector<1x1x16xf32> to vector<1x16xf32>
    %19 = vector.broadcast %18 : vector<1x16xf32> to vector<32x16xf32>
    %20 = arith.addf %16, %19 : vector<32x16xf32>
    %21 = math.tanh %20 : vector<32x16xf32>
    %c2 = arith.constant 2 : index
    %c0_21 = arith.constant 0 : index
    %c0_22 = arith.constant 0 : index
    %22 = vector.load %arg2[%c2, %c0_21, %c0_22] : memref<4x16x16xf32, #tpu.memory_space<vmem>>, vector<1x16x16xf32>
    %23 = vector.shape_cast %22 : vector<1x16x16xf32> to vector<16x16xf32>
    %cst_23 = arith.constant dense<0.000000e+00> : vector<32x16xf32>
    %24 = tpu.matmul %21, %23, %cst_23 {dimension_numbers = #tpu.dot_dimension_numbers<[1], [0], [0], [1], [0, 0, 1, 1], [], []>} : vector<32x16xf32>, vector<16x16xf32>, vector<32x16xf32> -> vector<32x16xf32>
    %c2_24 = arith.constant 2 : index
    %c0_25 = arith.constant 0 : index
    %c0_26 = arith.constant 0 : index
    %25 = vector.load %arg3[%c2_24, %c0_25, %c0_26] : memref<4x1x16xf32, #tpu.memory_space<vmem>>, vector<1x1x16xf32>
    %26 = vector.shape_cast %25 : vector<1x1x16xf32> to vector<1x16xf32>
    %27 = vector.broadcast %26 : vector<1x16xf32> to vector<32x16xf32>
    %28 = arith.addf %24, %27 : vector<32x16xf32>
    %29 = math.tanh %28 : vector<32x16xf32>
    %c3 = arith.constant 3 : index
    %c0_27 = arith.constant 0 : index
    %c0_28 = arith.constant 0 : index
    %30 = vector.load %arg2[%c3, %c0_27, %c0_28] : memref<4x16x16xf32, #tpu.memory_space<vmem>>, vector<1x16x16xf32>
    %31 = vector.shape_cast %30 : vector<1x16x16xf32> to vector<16x16xf32>
    %cst_29 = arith.constant dense<0.000000e+00> : vector<32x16xf32>
    %32 = tpu.matmul %29, %31, %cst_29 {dimension_numbers = #tpu.dot_dimension_numbers<[1], [0], [0], [1], [0, 0, 1, 1], [], []>} : vector<32x16xf32>, vector<16x16xf32>, vector<32x16xf32> -> vector<32x16xf32>
    %c3_30 = arith.constant 3 : index
    %c0_31 = arith.constant 0 : index
    %c0_32 = arith.constant 0 : index
    %33 = vector.load %arg3[%c3_30, %c0_31, %c0_32] : memref<4x1x16xf32, #tpu.memory_space<vmem>>, vector<1x1x16xf32>
    %34 = vector.shape_cast %33 : vector<1x1x16xf32> to vector<1x16xf32>
    %35 = vector.broadcast %34 : vector<1x16xf32> to vector<32x16xf32>
    %36 = arith.addf %32, %35 : vector<32x16xf32>
    %37 = vector.shape_cast %36 : vector<32x16xf32> to vector<4x8x16xf32>
    %cst_33 = arith.constant dense<0xFF800000> : vector<4x16xf32>
    %38 = vector.multi_reduction <maximumf>, %37, %cst_33 [1] : vector<4x8x16xf32> to vector<4x16xf32>
    %39 = vector.shape_cast %38 : vector<4x16xf32> to vector<4x1x16xf32>
    %40 = vector.broadcast %39 : vector<4x1x16xf32> to vector<4x8x16xf32>
    %41 = arith.subf %37, %40 : vector<4x8x16xf32>
    %42 = math.exp %41 : vector<4x8x16xf32>
    %cst_34 = arith.constant dense<0.000000e+00> : vector<4x16xf32>
    %43 = vector.multi_reduction <add>, %42, %cst_34 [1] : vector<4x8x16xf32> to vector<4x16xf32>
    %44 = vector.shape_cast %43 : vector<4x16xf32> to vector<4x1x16xf32>
    %45 = tpu.reciprocal %44 {approx = true} : vector<4x1x16xf32> -> vector<4x1x16xf32>
    %46 = vector.broadcast %45 : vector<4x1x16xf32> to vector<4x8x16xf32>
    %47 = arith.mulf %42, %46 : vector<4x8x16xf32>
    %48 = vector.extract_strided_slice %47 {offsets = [0, 0, 0], sizes = [4, 8, 8], strides = [1, 1, 1]} : vector<4x8x16xf32> to vector<4x8x8xf32>
    %c0_35 = arith.constant 0 : index
    %c0_36 = arith.constant 0 : index
    %c0_37 = arith.constant 0 : index
    %49 = vector.load %arg4[%c0_35, %c0_36, %c0_37] : memref<4x8x8xf32, #tpu.memory_space<vmem>>, vector<4x8x8xf32>
    tpu.vector_store %arg4[%c0_35, %c0_36, %c0_37], %48 {strides = array<i32>} : memref<4x8x8xf32, #tpu.memory_space<vmem>>, vector<4x8x8xf32>,
    return
  }
  func.func @transform_0(%arg0: i32) -> (i32, i32, i32) {
    %c0_i32 = arith.constant 0 : i32
    %c0_i32_0 = arith.constant 0 : i32
    %c0_i32_1 = arith.constant 0 : i32
    return %arg0, %c0_i32, %c0_i32_0 : i32, i32, i32
  }
  func.func @transform_1(%arg0: i32) -> (i32, i32, i32) {
    %c0_i32 = arith.constant 0 : i32
    %c0_i32_0 = arith.constant 0 : i32
    %c0_i32_1 = arith.constant 0 : i32
    %c0_i32_2 = arith.constant 0 : i32
    return %c0_i32, %c0_i32_0, %c0_i32_1 : i32, i32, i32
  }
  func.func @transform_2(%arg0: i32) -> (i32, i32, i32) {
    %c0_i32 = arith.constant 0 : i32
    %c0_i32_0 = arith.constant 0 : i32
    %c0_i32_1 = arith.constant 0 : i32
    %c0_i32_2 = arith.constant 0 : i32
    return %c0_i32, %c0_i32_0, %c0_i32_1 : i32, i32, i32
  }
  func.func @transform_3(%arg0: i32) -> (i32, i32, i32) {
    %c0_i32 = arith.constant 0 : i32
    %c0_i32_0 = arith.constant 0 : i32
    %c0_i32_1 = arith.constant 0 : i32
    return %arg0, %c0_i32, %c0_i32_0 : i32, i32, i32
  }
}

</mosaic_0001>

<bundles_post_ra>
// kernel: policy_forward_batched.1
= control target key start
LH: loop header
LB: loop body
LE: loop exit
PB: predicated region body
PF: predicated region fallthrough
CT: control target
= control target key end

     0   :  { %8 = vsyncpa [#allocation4], 0  ;;  %s640_s0 = inlined_call_operand.hbm [shape: f32[4,8,9], index: 0, kind: input, shape index: {}]   ;;  %s641_s1 = inlined_call_operand.hbm [shape: f32[4,16,16], index: 1, kind: input, shape index: {}]   ;;  %s642_s2 = inlined_call_operand.hbm [shape: f32[4,1,16], index: 2, kind: input, shape index: {}]   ;;  %s643_s3 = inlined_call_operand.hbm [shape: f32[4,8,8], index: 3, kind: output, shape index: {}]  }
   0x1   :  { %9 = vsyncpa [#allocation7], 0 }
   0x2   :  { %10 = vsyncpa [#allocation5], 0  ;;  %s28_s14 = sshll.u32 %s641_s1, 4  ;;  %s558_s15 = smov [#allocation6]   ;;  %s29_s14 = int_to_ptr.hbm [resolvable:$true] %s28_s14 }
   0x3   :  { %s30_s16 = sshll.u32 %s558_s15, 4  ;;  %s15_s19 = sshll.u32 %s640_s0, 4  ;;  %s31_s16 = int_to_ptr.vmem [resolvable:$true] %s30_s16  ;;  %s16_s19 = int_to_ptr.hbm [resolvable:$true] %s15_s19 }
   0x4   :  { %s559_s20 = smov 128   ;;  %s560_s21 = smov 8  }
   0x5   :  { %36 = dma.hbm_to_vmem [thread:$0]  %s29_s14, 1024, %s31_s16, [#allocation7], %s559_s20, %s559_s20, %s560_s21  }
   0x6   :  { %s561_s22 = smov [#allocation3]   ;;  %s41_s1 = sshll.u32 %s642_s2, 4  ;;  %s42_s1 = int_to_ptr.hbm [resolvable:$true] %s41_s1 }
   0x7   :  { %s17_s23 = sshll.u32 %s561_s22, 4  ;;  %s562_s0 = smov [#allocation8]   ;;  %s18_s23 = int_to_ptr.vmem [resolvable:$true] %s17_s23 }
   0x8   :  { %23 = dma.hbm_to_vmem [thread:$0]  %s16_s19, 512, %s18_s23, [#allocation4], %s559_s20, %s559_s20, %s560_s21  }
   0x9   :  { %s43_s26 = sshll.u32 %s562_s0, 4  ;;  %s563_s27 = smov 16   ;;  %s44_s26 = int_to_ptr.vmem [resolvable:$true] %s43_s26 }
   0xa   :  { %s564_s28 = smov 1  }
   0xb   :  { %49 = dma.hbm_to_vmem [thread:$0]  %s42_s1, 64, %s44_s26, [#allocation7], %s563_s27, %s563_s27, %s564_s28  }
   0xc   :  { %552 = dma.done.wait [#allocation4], 512  }
   0xd   :  { %553 = vsyncadd [#allocation4], 4294966784 }
   0xe   :  { %554 = dma.done.wait [#allocation7], 1088  }
   0xf   :  { %555 = vsyncadd [#allocation7], 4294966208  ;;  %vm62_vm0 = vcmask 130048   ;;  %v565_v0 = vmov 0.0   ;;  %vm71_vm1 = vcmask 72704   ;;  %v81_v1 = vld [vmem:[#allocation6 + $0x8] sm:$0xff] }
  0x10   :  { %63 = vst.msk [vmem:[#allocation2] sm:$0xff] %vm62_vm0, %v565_v0  ;;  %v80_v2 = vld [vmem:[#allocation6] sm:$0xff]  ;;  %112 = vmatpush.msra.mxu0 %v81_v1  ;;  %v68_v4 = vld [vmem:[#allocation3 + $0x8] sm:$0xff]  ;;  %v69_v5 = vld [vmem:[#allocation3 + $0x10] sm:$0xff]  ;;  %vm362_vm2 = vcmask 64512   ;;  %s566_s2 = smov [#allocation9]  }
  0x11   :  { %64 = vst.msk [vmem:[#allocation2 + $0x8] sm:$0xff] %vm62_vm0, %v565_v0  ;;  %v67_v3 = vld [vmem:[#allocation3] sm:$0xff]  ;;  %v70_v6 = vld [vmem:[#allocation3 + $0x18] sm:$0xff]  ;;  %v132_v12 = vld [vmem:[#allocation6 + $0x10] sm:$0xff]  ;;  %s371_s29 = sshll.u32 %s566_s2, 4  ;;  %s373_s5 = sshll.u32 %s643_s3, 4  ;;  %s372_s29 = int_to_ptr.vmem [resolvable:$true] %s371_s29  ;;  %s374_s5 = int_to_ptr.hbm [resolvable:$true] %s373_s5 }
  0x12   :  { %65 = vst.msk [vmem:[#allocation2 + $0x10] sm:$0xff] %vm62_vm0, %v565_v0  ;;  %113 = vmatpush.msra.mxu0 %v80_v2  ;;  %v133_v11 = vld [vmem:[#allocation6 + $0x18] sm:$0xff]  ;;  %v412_v13 = vld [vmem:[#allocation8] ss:$0 sm:$0xff]  ;;  %v186_v26 = vld [vmem:[#allocation6 + $0x28] sm:$0xff] }
  0x13   :  { %66 = vst.msk [vmem:[#allocation2 + $0x18] sm:$0xff] %vm62_vm0, %v565_v0  ;;  %165 = vmatpush.msra.mxu1 %v133_v11  ;;  %218 = vmatpush.msra.mxu2 %v186_v26  ;;  %v185_v27 = vld [vmem:[#allocation6 + $0x20] sm:$0xff]  ;;  %v239_v41 = vld [vmem:[#allocation6 + $0x38] sm:$0xff]  ;;  %v238_v42 = vld [vmem:[#allocation6 + $0x30] sm:$0xff] }
  0x14   :  { %72 = vst.msk [vmem:[#allocation2] sm:$0xff] %vm71_vm1, %v67_v3  ;;  %v413_v28 = vld [vmem:[#allocation8 + $0x1] ss:$0 sm:$0xff]  ;;  %271 = vmatpush.msra.mxu3 %v239_v41  ;;  %v414_v43 = vld [vmem:[#allocation8 + $0x2] ss:$0 sm:$0xff] }
  0x15   :  { %73 = vst.msk [vmem:[#allocation2 + $0x8] sm:$0xff] %vm71_vm1, %v68_v4  ;;  %166 = vmatpush.msra.mxu1 %v132_v12  ;;  %219 = vmatpush.msra.mxu2 %v185_v27  ;;  %v415_v56 = vld [vmem:[#allocation8 + $0x3] ss:$0 sm:$0xff] }
  0x16   :  { %74 = vst.msk [vmem:[#allocation2 + $0x10] sm:$0xff] %vm71_vm1, %v69_v5  ;;  %272 = vmatpush.msra.mxu3 %v238_v42 }
  0x17   :  { %75 = vst.msk [vmem:[#allocation2 + $0x18] sm:$0xff] %vm71_vm1, %v70_v6 }
  0x1b   :  { %v76_v7 = vld [vmem:[#allocation2] sm:$0xff] }
  0x1c   :  { %387 = vmatmul.msk.f32.vlgmr.msra.gmra.mxu0 %vm62_vm0, %v76_v7  ;;  %v77_v8 = vld [vmem:[#allocation2 + $0x8] sm:$0xff] }
  0x1d   :  { %v78_v9 = vld [vmem:[#allocation2 + $0x10] sm:$0xff] }
  0x1e   :  { %v79_v10 = vld [vmem:[#allocation2 + $0x18] sm:$0xff] }
  0x24   :  { %388 = vmatmul.msk.f32.gmra.mxu0 %vm62_vm0, %v77_v8 }
  0x2c   :  { %389 = vmatmul.msk.f32.gmra.mxu0 %vm62_vm0, %v78_v9 }
  0x34   :  { %390 = vmatmul.msk.f32.gmra.mxu0 %vm62_vm0, %v79_v10 }
  0x99   :  { %v115_v14 = vpop.f32.mrf.mxu0 }
  0x9a   :  { %v116_v15 = vadd.f32 %v412_v13, %v115_v14 }
  0x9c   :  { %416 = vtanh.f32 %v116_v15 }
  0xa1   :  { %v118_v16 = vpop.f32.mrf.mxu0 }
  0xa2   :  { %v417_v17 = vpop.eup %416  ;;  %v119_v18 = vadd.f32 %v412_v13, %v118_v16 }
  0xa3   :  { %391 = vmatmul.msk.f32.vlgmr.msra.gmra.mxu1 %vm62_vm0, %v417_v17 }
  0xa4   :  { %418 = vtanh.f32 %v119_v18 }
  0xa9   :  { %v121_v19 = vpop.f32.mrf.mxu0 }
  0xaa   :  { %v419_v20 = vpop.eup %418  ;;  %v122_v21 = vadd.f32 %v412_v13, %v121_v19 }
  0xab   :  { %392 = vmatmul.msk.f32.gmra.mxu1 %vm62_vm0, %v419_v20 }
  0xac   :  { %420 = vtanh.f32 %v122_v21 }
  0xb1   :  { %v124_v22 = vpop.f32.mrf.mxu0 }
  0xb2   :  { %v421_v23 = vpop.eup %420  ;;  %v125_v24 = vadd.f32 %v412_v13, %v124_v22 }
  0xb3   :  { %393 = vmatmul.msk.f32.gmra.mxu1 %vm62_vm0, %v421_v23 }
  0xb4   :  { %422 = vtanh.f32 %v125_v24 }
  0xba   :  { %v423_v25 = vpop.eup %422 }
  0xbb   :  { %394 = vmatmul.msk.f32.gmra.mxu1 %vm62_vm0, %v423_v25 }
 0x120   :  { %v168_v29 = vpop.f32.mrf.mxu1 }
 0x121   :  { %v169_v30 = vadd.f32 %v413_v28, %v168_v29 }
 0x123   :  { %424 = vtanh.f32 %v169_v30 }
 0x128   :  { %v171_v31 = vpop.f32.mrf.mxu1 }
 0x129   :  { %v425_v32 = vpop.eup %424  ;;  %v172_v33 = vadd.f32 %v413_v28, %v171_v31 }
 0x12a   :  { %395 = vmatmul.msk.f32.vlgmr.msra.gmra.mxu2 %vm62_vm0, %v425_v32 }
 0x12b   :  { %426 = vtanh.f32 %v172_v33 }
 0x130   :  { %v174_v34 = vpop.f32.mrf.mxu1 }
 0x131   :  { %v427_v35 = vpop.eup %426  ;;  %v175_v36 = vadd.f32 %v413_v28, %v174_v34 }
 0x132   :  { %396 = vmatmul.msk.f32.gmra.mxu2 %vm62_vm0, %v427_v35 }
 0x133   :  { %428 = vtanh.f32 %v175_v36 }
 0x138   :  { %v177_v37 = vpop.f32.mrf.mxu1 }
 0x139   :  { %v429_v38 = vpop.eup %428  ;;  %v178_v39 = vadd.f32 %v413_v28, %v177_v37 }
 0x13a   :  { %397 = vmatmul.msk.f32.gmra.mxu2 %vm62_vm0, %v429_v38 }
 0x13b   :  { %430 = vtanh.f32 %v178_v39 }
 0x141   :  { %v431_v40 = vpop.eup %430 }
 0x142   :  { %398 = vmatmul.msk.f32.gmra.mxu2 %vm62_vm0, %v431_v40 }
 0x1ad   :  { %v221_v44 = vpop.f32.mrf.mxu2 }
 0x1ae   :  { %v222_v45 = vadd.f32 %v414_v43, %v221_v44 }
 0x1b0   :  { %432 = vtanh.f32 %v222_v45 }
 0x1b5   :  { %v224_v46 = vpop.f32.mrf.mxu2 }
 0x1b6   :  { %v433_v47 = vpop.eup %432  ;;  %v225_v48 = vadd.f32 %v414_v43, %v224_v46 }
 0x1b7   :  { %399 = vmatmul.msk.f32.vlgmr.msra.gmra.mxu3 %vm62_vm0, %v433_v47 }
 0x1b8   :  { %434 = vtanh.f32 %v225_v48 }
 0x1bd   :  { %v227_v49 = vpop.f32.mrf.mxu2 }
 0x1be   :  { %v435_v50 = vpop.eup %434  ;;  %v228_v51 = vadd.f32 %v414_v43, %v227_v49 }
 0x1bf   :  { %400 = vmatmul.msk.f32.gmra.mxu3 %vm62_vm0, %v435_v50 }
 0x1c0   :  { %436 = vtanh.f32 %v228_v51 }
 0x1c5   :  { %v230_v52 = vpop.f32.mrf.mxu2 }
 0x1c6   :  { %v437_v53 = vpop.eup %436  ;;  %v231_v54 = vadd.f32 %v414_v43, %v230_v52 }
 0x1c7   :  { %401 = vmatmul.msk.f32.gmra.mxu3 %vm62_vm0, %v437_v53 }
 0x1c8   :  { %438 = vtanh.f32 %v231_v54 }
 0x1ce   :  { %v439_v55 = vpop.eup %438 }
 0x1cf   :  { %402 = vmatmul.msk.f32.gmra.mxu3 %vm62_vm0, %v439_v55 }
 0x23a   :  { %v274_v57 = vpop.f32.mrf.mxu3 }
 0x23b   :  { %v275_v58 = vadd.f32 %v415_v56, %v274_v57 }
 0x23d   :  { %v286_v59 = vsel %vm62_vm0, %v275_v58, -inf }
 0x23e   :  { %v287_v60 = vrot.slane %v286_v59, 4 }
 0x240   :  { %v288_v61 = vmax.f32 %v286_v59, %v287_v60 }
 0x242   :  { %v289_v62 = vrot.slane %v288_v61, 2  ;;  %v277_v63 = vpop.f32.mrf.mxu3 }
 0x243   :  { %v278_v0 = vadd.f32 %v415_v56, %v277_v63 }
 0x244   :  { %v290_v1 = vmax.f32 %v288_v61, %v289_v62 }
 0x245   :  { %v293_v2 = vsel %vm62_vm0, %v278_v0, -inf }
 0x246   :  { %v291_v3 = vrot.slane %v290_v1, 1  ;;  %v294_v4 = vrot.slane %v293_v2, 4 }
 0x248   :  { %v292_v5 = vmax.f32 %v290_v1, %v291_v3  ;;  %v295_v6 = vmax.f32 %v293_v2, %v294_v4 }
 0x24a   :  { %v314_v7 = vsub.f32 %v275_v58, %v292_v5  ;;  %v296_v8 = vrot.slane %v295_v6, 2  ;;  %v280_v9 = vpop.f32.mrf.mxu3 }
 0x24b   :  { %v281_v10 = vadd.f32 %v415_v56, %v280_v9 }
 0x24c   :  { %v318_v11 = vmul.f32 1.442695, %v314_v7  ;;  %v297_v12 = vmax.f32 %v295_v6, %v296_v8 }
 0x24d   :  { %v300_v13 = vsel %vm62_vm0, %v281_v10, -inf }
 0x24e   :  { %440 = vpow2.f32 %v318_v11  ;;  %v298_v14 = vrot.slane %v297_v12, 1  ;;  %v301_v15 = vrot.slane %v300_v13, 4 }
 0x250   :  { %v299_v16 = vmax.f32 %v297_v12, %v298_v14  ;;  %v302_v17 = vmax.f32 %v300_v13, %v301_v15 }
 0x252   :  { %v315_v18 = vsub.f32 %v278_v0, %v299_v16  ;;  %v303_v19 = vrot.slane %v302_v17, 2  ;;  %v283_v20 = vpop.f32.mrf.mxu3 }
 0x253   :  { %v284_v21 = vadd.f32 %v415_v56, %v283_v20 }
 0x254   :  { %v441_v22 = vpop.eup %440  ;;  %v320_v23 = vmul.f32 1.442695, %v315_v18  ;;  %v304_v24 = vmax.f32 %v302_v17, %v303_v19 }
 0x255   :  { %v326_v25 = vsel %vm62_vm0, %v441_v22, 0.0  ;;  %v307_v26 = vsel %vm62_vm0, %v284_v21, -inf }
 0x256   :  { %v327_v27 = vrot.slane %v326_v25, 4  ;;  %442 = vpow2.f32 %v320_v23  ;;  %v305_v28 = vrot.slane %v304_v24, 1  ;;  %v308_v29 = vrot.slane %v307_v26, 4 }
 0x258   :  { %v328_v30 = vadd.f32 %v327_v27, %v326_v25  ;;  %v306_v31 = vmax.f32 %v304_v24, %v305_v28  ;;  %v309_v32 = vmax.f32 %v307_v26, %v308_v29 }
 0x25a   :  { %v329_v33 = vrot.slane %v328_v30, 2  ;;  %v316_v34 = vsub.f32 %v281_v10, %v306_v31  ;;  %v310_v35 = vrot.slane %v309_v32, 2 }
 0x25c   :  { %v443_v36 = vpop.eup %442  ;;  %v330_v37 = vadd.f32 %v329_v33, %v328_v30  ;;  %v322_v38 = vmul.f32 1.442695, %v316_v34  ;;  %v311_v39 = vmax.f32 %v309_v32, %v310_v35 }
 0x25d   :  { %v333_v40 = vsel %vm62_vm0, %v443_v36, 0.0 }
 0x25e   :  { %v331_v41 = vrot.slane %v330_v37, 1  ;;  %v334_v42 = vrot.slane %v333_v40, 4  ;;  %444 = vpow2.f32 %v322_v38  ;;  %v312_v43 = vrot.slane %v311_v39, 1 }
 0x260   :  { %v332_v44 = vadd.f32 %v331_v41, %v330_v37  ;;  %v335_v45 = vadd.f32 %v334_v42, %v333_v40  ;;  %v313_v46 = vmax.f32 %v311_v39, %v312_v43 }
 0x262   :  { %446 = vrcp.f32 %v332_v44  ;;  %v336_v47 = vrot.slane %v335_v45, 2  ;;  %v317_v48 = vsub.f32 %v284_v21, %v313_v46 }
 0x264   :  { %v445_v49 = vpop.eup %444  ;;  %v337_v50 = vadd.f32 %v336_v47, %v335_v45  ;;  %v324_v51 = vmul.f32 1.442695, %v317_v48 }
 0x265   :  { %v340_v52 = vsel %vm62_vm0, %v445_v49, 0.0 }
 0x266   :  { %v338_v53 = vrot.slane %v337_v50, 1  ;;  %v341_v54 = vrot.slane %v340_v52, 4  ;;  %448 = vpow2.f32 %v324_v51 }
 0x268   :  { %v447_v55 = vpop.eup %446  ;;  %v339_v56 = vadd.f32 %v338_v53, %v337_v50  ;;  %v342_v57 = vadd.f32 %v341_v54, %v340_v52 }
 0x269   :  { %v358_v58 = vmul.f32 %v447_v55, %v441_v22 }
 0x26a   :  { %450 = vrcp.f32 %v339_v56  ;;  %v343_v59 = vrot.slane %v342_v57, 2 }
 0x26b   :  { %363 = vst.msk [vmem:[#allocation9] sm:$0xff] %vm362_vm2, %v358_v58 }
 0x26c   :  { %v449_v60 = vpop.eup %448  ;;  %v344_v61 = vadd.f32 %v343_v59, %v342_v57 }
 0x26d   :  { %v347_v62 = vsel %vm62_vm0, %v449_v60, 0.0 }
 0x26e   :  { %v345_v63 = vrot.slane %v344_v61, 1  ;;  %v348_v0 = vrot.slane %v347_v62, 4 }
 0x270   :  { %v451_v1 = vpop.eup %450  ;;  %v346_v2 = vadd.f32 %v345_v63, %v344_v61  ;;  %v349_v3 = vadd.f32 %v348_v0, %v347_v62 }
 0x271   :  { %v359_v4 = vmul.f32 %v451_v1, %v443_v36 }
 0x272   :  { %452 = vrcp.f32 %v346_v2  ;;  %v350_v5 = vrot.slane %v349_v3, 2 }
 0x273   :  { %364 = vst.msk [vmem:[#allocation9 + $0x8] sm:$0xff] %vm362_vm2, %v359_v4 }
 0x274   :  { %v351_v6 = vadd.f32 %v350_v5, %v349_v3 }
 0x276   :  { %v352_v7 = vrot.slane %v351_v6, 1 }
 0x278   :  { %v453_v8 = vpop.eup %452  ;;  %v353_v9 = vadd.f32 %v352_v7, %v351_v6 }
 0x279   :  { %v360_v10 = vmul.f32 %v453_v8, %v445_v49 }
 0x27a   :  { %454 = vrcp.f32 %v353_v9 }
 0x27b   :  { %365 = vst.msk [vmem:[#allocation9 + $0x10] sm:$0xff] %vm362_vm2, %v360_v10 }
 0x280   :  { %v455_v11 = vpop.eup %454 }
 0x281   :  { %v361_v12 = vmul.f32 %v455_v11, %v449_v60 }
 0x283   :  { %366 = vst.msk [vmem:[#allocation9 + $0x18] sm:$0xff] %vm362_vm2, %v361_v12 }
 0x284   :  { %379 = dma.vmem_to_hbm [thread:$0]  %s372_s29, 512, %s374_s5, [#allocation5], %s559_s20, %s559_s20, %s560_s21  }
 0x285   :  { %556 = dma.done.wait [#allocation5], 512  }
 0x286   :  { %557 = vsyncadd [#allocation5], 4294966784 }
 0x287   :  { %384 = vsyncpa [#allocation4], 1 }
 0x288   :  { %385 = vsyncpa [#allocation7], 1 }
 0x289   :  { %386 = vsyncpa [#allocation5], 1 }

</bundles_post_ra>
